<compile_context>
chip_gen: v7x
topology: tpu7x:2x2x1
jax: 0.10.0
libtpu: 0.0.40
codegen_flags: <defaults>
</compile_context>

<pallas_src>
import jax
import jax.numpy as jnp
from jax.experimental import pallas as pl
from jax.experimental.pallas import tpu as pltpu

IN_FEATURES = 784
HIDDEN = 20


def _round_up(n, m):
    return ((n + m - 1) // m) * m


def _choose_tm(batch, x_dtype):
    """Rows per grid step.

    Multiple of 8, capped by a dtype-dependent VMEM-friendly maximum, and —
    when the batch is big enough that each half is still a large tile — capped
    at ~half the batch so the 'parallel' grid has >= 2 balanced steps (both
    v7x TensorCores get work).
    """
    tm_max = 8192 if jnp.dtype(x_dtype).itemsize <= 2 else 4096
    b8 = _round_up(batch, 8)
    tm = min(tm_max, b8)
    # 512-row tiles already reach ~85% of HBM roofline, so only force the
    # 2-way split once each half-tile is >= 512 rows.
    if b8 >= 1024:
        half = _round_up(pl.cdiv(b8, 2), 8)
        tm = min(tm, half)
    return tm


def _vmem_limit_bytes(tm, x_itemsize):
    """Explicit scoped-VMEM limit, only when the default would be too small."""
    need = (
        2 * tm * IN_FEATURES * x_itemsize   # double-buffered x stream
        + 2 * tm * HIDDEN * 4               # double-buffered f32 output
        + IN_FEATURES * HIDDEN * 4          # resident w1 (f32 upper bound)
        + 128 * 4                           # resident b1 (padded)
    )
    need = int(need * 1.5) + (4 << 20)      # pipeline / internal-scratch headroom
    if need <= (16 << 20):                  # fits every generation's default
        return None
    return min(need, 48 << 20)              # stay under v7x's 64 MiB physical VMEM


def fcnet_kernel(x_ref, w1_ref, b1_ref, o_ref):
    # x_ref : (TM, 784)  f32 or bf16
    # w1_ref: (784, 20)  f32 or bf16   (pre-transposed vs PyTorch's (20, 784))
    # b1_ref: (1, 20)    f32
    # o_ref : (TM, 20)   f32
    x = x_ref[...]
    w1 = w1_ref[...]
    b1 = b1_ref[...]

    # fc1: MXU matmul, f32 accumulation regardless of input dtype.
    h = jnp.dot(x, w1, preferred_element_type=jnp.float32) + b1

    # relu (dropout is identity at inference; second relu is idempotent -> elided)
    # TODO(synk): training-mode dropout (pltpu.prng_* mask + 1/(1-p) scale) not emitted.
    h = jnp.maximum(h, 0.0)

    # log_softmax over the feature axis, numerically stable shifted form.
    m = jnp.max(h, axis=-1, keepdims=True)
    s = h - m
    lse = jnp.log(jnp.sum(jnp.exp(s), axis=-1, keepdims=True))
    o_ref[...] = (s - lse).astype(o_ref.dtype)


def fcnet_forward(x_nchw, w1_t, b1_2d, *, tm=None):
    """x_nchw: (B, 1, 28, 28); w1_t: (784, 20); b1_2d: (1, 20) -> (B, 20) f32.

    No dtype casts and no padding copies here: feed bf16 x / w1_t (produced
    upstream) for ~2x HBM bandwidth; the kernel accumulates in f32 either way.
    Ragged batches are handled by Pallas's masked partial last block.
    """
    B = x_nchw.shape[0]
    x2d = x_nchw.reshape(B, -1)                      # (B, 784)

    if tm is None:
        tm = _choose_tm(B, x2d.dtype)
    grid = (pl.cdiv(B, tm),)
    vmem_limit = _vmem_limit_bytes(tm, jnp.dtype(x2d.dtype).itemsize)

    out = pl.pallas_call(
        fcnet_kernel,
        out_shape=jax.ShapeDtypeStruct((B, HIDDEN), jnp.float32),
        grid=grid,
        in_specs=[
            # x streams one (tm, 784) tile per grid step (double-buffered);
            # the last tile may overhang B and is masked by Pallas.
            pl.BlockSpec((tm, IN_FEATURES), lambda i: (i, 0)),
            # Weights/bias: same block index every step -> VMEM-resident.
            pl.BlockSpec((IN_FEATURES, HIDDEN), lambda i: (0, 0)),
            pl.BlockSpec((1, HIDDEN), lambda i: (0, 0)),
        ],
        out_specs=pl.BlockSpec((tm, HIDDEN), lambda i: (i, 0)),
        compiler_params=pltpu.CompilerParams(
            # Independent batch tiles -> shard across both v7x TensorCores.
            dimension_semantics=("parallel",),
            vmem_limit_bytes=vmem_limit,
        ),
    )(x2d, w1_t, b1_2d)

    return out


def init_params(key, dtype=jnp.float32):
    """nn.Linear-style init (uniform +/- 1/sqrt(fan_in)).

    Returns the weight already transposed to (784, 20) in the requested stream
    dtype (use bf16 for ~2x bandwidth) and the bias as (1, 20) f32, so the
    forward wrapper does zero per-call layout/dtype work.
    """
    k_w, k_b = jax.random.split(key)
    bound = 1.0 / jnp.sqrt(float(IN_FEATURES))
    w1 = jax.random.uniform(k_w, (HIDDEN, IN_FEATURES), jnp.float32, -bound, bound)
    b1 = jax.random.uniform(k_b, (HIDDEN,), jnp.float32, -bound, bound)
    w1_t = jnp.transpose(w1).astype(dtype)           # (784, 20), hoisted out of forward
    b1_2d = b1.reshape(1, HIDDEN).astype(jnp.float32)
    return w1_t, b1_2d


def reference_forward(x_nchw, w1_t, b1_2d):
    """Pure-JAX reference for validation (f32 math on the given inputs)."""
    B = x_nchw.shape[0]
    x = x_nchw.reshape(B, -1).astype(jnp.float32)
    h = x @ w1_t.astype(jnp.float32) + b1_2d
    h = jnp.maximum(h, 0.0)
    return jax.nn.log_softmax(h, axis=1)


if __name__ == "__main__":
    key = jax.random.PRNGKey(0)
    k_x, k_p = jax.random.split(key)

    # --- f32 path, tiny ragged batch (B=2 -> single partial 8-row block). ---
    B = 2
    x = jax.random.normal(k_x, (B, 1, 28, 28), jnp.float32)   # NCHW, 1*28*28 = 784
    w1_t, b1_2d = init_params(k_p, dtype=jnp.float32)

    out = jax.block_until_ready(fcnet_forward(x, w1_t, b1_2d))
    ref = reference_forward(x, w1_t, b1_2d)
    assert out.shape == (B, HIDDEN)
    assert jnp.allclose(out, ref, atol=1e-5, rtol=1e-5)

    # --- f32 path, ragged multi-step grid (pipelining + masked last block). ---
    B2 = 200
    x2 = jax.random.normal(k_x, (B2, 1, 28, 28), jnp.float32)
    out2 = jax.block_until_ready(fcnet_forward(x2, w1_t, b1_2d, tm=64))
    ref2 = reference_forward(x2, w1_t, b1_2d)
    assert out2.shape == (B2, HIDDEN)
    assert jnp.allclose(out2, ref2, atol=1e-5, rtol=1e-5)

    # --- bf16 streaming path (bf16 x / w1 produced "upstream", f32 accum). ---
    w1_bf16, b1_f32 = init_params(k_p, dtype=jnp.bfloat16)
    x_bf16 = x2.astype(jnp.bfloat16)   # stands in for a bf16 data pipeline
    out_bf = jax.block_until_ready(fcnet_forward(x_bf16, w1_bf16, b1_f32, tm=64))
    ref_bf = reference_forward(x_bf16, w1_bf16, b1_f32)
    assert out_bf.shape == (B2, HIDDEN)
    assert jnp.allclose(out_bf, ref_bf, atol=2e-2, rtol=2e-2)

    print("KERNEL_OK")
</pallas_src>

<mosaic_0001>
module attributes {stable_mosaic.version = 11 : i64} {
  func.func @fcnet_kernel(%arg0: i32, %arg1: memref<8x784xf32, #tpu.memory_space<vmem>>, %arg2: memref<784x20xf32, #tpu.memory_space<vmem>>, %arg3: memref<1x20xf32, #tpu.memory_space<vmem>>, %arg4: memref<8x20xf32, #tpu.memory_space<vmem>>) attributes {dimension_semantics = [#tpu.dimension_semantics<parallel>], iteration_bounds = array<i64: 1>, scalar_prefetch = 0 : i64, scratch_operands = 0 : i64, tpu.core_type = #tpu.core_type<tc>, window_params = [{transform_indices = @transform_0, window_bounds = array<i64: 8, 784>}, {pipeline_mode = #tpu.pipeline_mode<synchronous>, transform_indices = @transform_1, window_bounds = array<i64: 784, 20>}, {pipeline_mode = #tpu.pipeline_mode<synchronous>, transform_indices = @transform_2, window_bounds = array<i64: 1, 20>}, {transform_indices = @transform_3, window_bounds = array<i64: 8, 20>}]} {
    %c0 = arith.constant 0 : index
    %c0_0 = arith.constant 0 : index
    %0 = vector.load %arg1[%c0, %c0_0] : memref<8x784xf32, #tpu.memory_space<vmem>>, vector<8x784xf32>
    %c0_1 = arith.constant 0 : index
    %c0_2 = arith.constant 0 : index
    %1 = vector.load %arg2[%c0_1, %c0_2] : memref<784x20xf32, #tpu.memory_space<vmem>>, vector<784x20xf32>
    %c0_3 = arith.constant 0 : index
    %c0_4 = arith.constant 0 : index
    %2 = vector.load %arg3[%c0_3, %c0_4] : memref<1x20xf32, #tpu.memory_space<vmem>>, vector<1x20xf32>
    %cst = arith.constant dense<0.000000e+00> : vector<8x20xf32>
    %3 = tpu.matmul %0, %1, %cst {dimension_numbers = #tpu.dot_dimension_numbers<[1], [0], [0], [1], [0, 0, 1, 1], [], []>} : vector<8x784xf32>, vector<784x20xf32>, vector<8x20xf32> -> vector<8x20xf32>
    %4 = vector.broadcast %2 : vector<1x20xf32> to vector<8x20xf32>
    %5 = arith.addf %3, %4 : vector<8x20xf32>
    %cst_5 = arith.constant 0.000000e+00 : f32
    %6 = vector.broadcast %cst_5 : f32 to vector<8x20xf32>
    %7 = arith.maximumf %5, %6 : vector<8x20xf32>
    %cst_6 = arith.constant dense<0xFF800000> : vector<8xf32>
    %8 = vector.multi_reduction <maximumf>, %7, %cst_6 [1] : vector<8x20xf32> to vector<8xf32>
    %9 = vector.shape_cast %8 : vector<8xf32> to vector<8x1xf32>
    %10 = vector.broadcast %9 : vector<8x1xf32> to vector<8x20xf32>
    %11 = arith.subf %7, %10 : vector<8x20xf32>
    %12 = math.exp %11 : vector<8x20xf32>
    %cst_7 = arith.constant dense<0.000000e+00> : vector<8xf32>
    %13 = vector.multi_reduction <add>, %12, %cst_7 [1] : vector<8x20xf32> to vector<8xf32>
    %14 = vector.shape_cast %13 : vector<8xf32> to vector<8x1xf32>
    %15 = math.log %14 : vector<8x1xf32>
    %16 = vector.broadcast %15 : vector<8x1xf32> to vector<8x20xf32>
    %17 = arith.subf %11, %16 : vector<8x20xf32>
    %c0_8 = arith.constant 0 : index
    %c0_9 = arith.constant 0 : index
    %18 = vector.load %arg4[%c0_8, %c0_9] : memref<8x20xf32, #tpu.memory_space<vmem>>, vector<8x20xf32>
    tpu.vector_store %arg4[%c0_8, %c0_9], %17 {strides = array<i32>} : memref<8x20xf32, #tpu.memory_space<vmem>>, vector<8x20xf32>,
    return
  }
  func.func @transform_0(%arg0: i32) -> (i32, i32) {
    %c0_i32 = arith.constant 0 : i32
    %c0_i32_0 = arith.constant 0 : i32
    return %arg0, %c0_i32 : i32, i32
  }
  func.func @transform_1(%arg0: i32) -> (i32, i32) {
    %c0_i32 = arith.constant 0 : i32
    %c0_i32_0 = arith.constant 0 : i32
    %c0_i32_1 = arith.constant 0 : i32
    return %c0_i32, %c0_i32_0 : i32, i32
  }
  func.func @transform_2(%arg0: i32) -> (i32, i32) {
    %c0_i32 = arith.constant 0 : i32
    %c0_i32_0 = arith.constant 0 : i32
    %c0_i32_1 = arith.constant 0 : i32
    return %c0_i32, %c0_i32_0 : i32, i32
  }
  func.func @transform_3(%arg0: i32) -> (i32, i32) {
    %c0_i32 = arith.constant 0 : i32
    %c0_i32_0 = arith.constant 0 : i32
    return %arg0, %c0_i32 : i32, i32
  }
}

</mosaic_0001>

<bundles_post_ra>
// kernel: tpu_custom_call.1
= control target key start
LH: loop header
LB: loop body
LE: loop exit
PB: predicated region body
PF: predicated region fallthrough
CT: control target
= control target key end

     0   :  { %8 = vsyncpa [#allocation3], 0  ;;  %v790_v51 = vmov 1983009808   ;;  %v143_v53 = vlaneseq  ;;  %vm792_vm0 = vmmov 0   ;;  %vm213_vm1 = vcmask 130048   ;;  %s1163_s0 = inlined_call_operand.vmem [shape: f32[2,784], index: 0, kind: input, shape index: {}]   ;;  %s1164_s1 = inlined_call_operand.vmem [shape: f32[784,20], index: 1, kind: input, shape index: {}]   ;;  %s1165_s2 = inlined_call_operand.vmem [shape: f32[1,20], index: 2, kind: input, shape index: {}]   ;;  %s1166_s3 = inlined_call_operand.hbm [shape: f32[2,20], index: 3, kind: output, shape index: {}]  }
   0x1   :  { %v39_v0 = vld [vmem:[%s1164_s1 + $0x80] sm:$0xff]  ;;  %v40_v1 = vld [vmem:[%s1164_s1 + $0x88] sm:$0xff]  ;;  %v41_v12 = vld [vmem:[%s1164_s1 + $0x90] sm:$0xff]  ;;  %v141_v52 = vunpack.c.l.s4 %v790_v51  ;;  %vm497_vm2 = vcmask 162816  }
   0x2   :  { %v644_v2 = vpack.c.bf16 %v40_v1, %v39_v0  ;;  %v23_v3 = vld [vmem:[%s1164_s1] sm:$0xff]  ;;  %v24_v4 = vld [vmem:[%s1164_s1 + $0x8] sm:$0xff]  ;;  %v42_v13 = vld [vmem:[%s1164_s1 + $0x98] sm:$0xff] }
   0x3   :  { %v71_v5 = vld [vmem:[%s1164_s1 + $0x180] sm:$0xff]  ;;  %v646_v6 = vpack.c.bf16 %v24_v4, %v23_v3  ;;  %v72_v7 = vld [vmem:[%s1164_s1 + $0x188] sm:$0xff]  ;;  %v25_v14 = vld [vmem:[%s1164_s1 + $0x10] sm:$0xff]  ;;  %v648_v15 = vpack.c.bf16 %v42_v13, %v41_v12  ;;  %v144_v3 = vshrl.u32 %v143_v53, 7 }
   0x4   :  { %v55_v8 = vld [vmem:[%s1164_s1 + $0x100] sm:$0xff]  ;;  %v56_v9 = vld [vmem:[%s1164_s1 + $0x108] sm:$0xff]  ;;  %645 = vmatprep.subr.bf16.mxu0 %v644_v2  ;;  %v676_v10 = vpack.c.bf16 %v72_v7, %v71_v5  ;;  %v26_v16 = vld [vmem:[%s1164_s1 + $0x18] sm:$0xff]  ;;  %v142_v2 = vunpack.c.0.s8 %v141_v52 }
   0x5   :  { %v678_v11 = vpack.c.bf16 %v56_v9, %v55_v8  ;;  %647 = vmatpush3.bf16.msra.mxu0 %v646_v6  ;;  %v73_v17 = vld [vmem:[%s1164_s1 + $0x190] sm:$0xff]  ;;  %v74_v18 = vld [vmem:[%s1164_s1 + $0x198] sm:$0xff]  ;;  %v650_v19 = vpack.c.bf16 %v26_v16, %v25_v14  ;;  %v43_v23 = vld [vmem:[%s1164_s1 + $0xa0] sm:$0xff] }
   0x6   :  { %677 = vmatprep.subr.bf16.mxu1 %v676_v10  ;;  %v680_v20 = vpack.c.bf16 %v74_v18, %v73_v17  ;;  %v57_v21 = vld [vmem:[%s1164_s1 + $0x110] sm:$0xff]  ;;  %v58_v22 = vld [vmem:[%s1164_s1 + $0x118] sm:$0xff]  ;;  %649 = vmatprep.subr.bf16.mxu0 %v648_v15  ;;  %v44_v25 = vld [vmem:[%s1164_s1 + $0xa8] sm:$0xff] }
   0x7   :  { %679 = vmatpush3.bf16.msra.mxu1 %v678_v11  ;;  %v682_v24 = vpack.c.bf16 %v58_v22, %v57_v21  ;;  %v27_v26 = vld [vmem:[%s1164_s1 + $0x20] sm:$0xff]  ;;  %v28_v27 = vld [vmem:[%s1164_s1 + $0x28] sm:$0xff]  ;;  %v652_v28 = vpack.c.bf16 %v44_v25, %v43_v23  ;;  %v45_v35 = vld [vmem:[%s1164_s1 + $0xb0] sm:$0xff] }
   0x8   :  { %681 = vmatprep.subr.bf16.mxu1 %v680_v20  ;;  %v75_v29 = vld [vmem:[%s1164_s1 + $0x1a0] sm:$0xff]  ;;  %v76_v30 = vld [vmem:[%s1164_s1 + $0x1a8] sm:$0xff]  ;;  %v654_v32 = vpack.c.bf16 %v28_v27, %v27_v26  ;;  %v46_v36 = vld [vmem:[%s1164_s1 + $0xb8] sm:$0xff]  ;;  %v985_v20 = vsub.s32 %v142_v2, %v144_v3 }
   0x9   :  { %v59_v31 = vld [vmem:[%s1164_s1 + $0x120] sm:$0xff]  ;;  %651 = vmatpush3.bf16.msra.mxu0 %v650_v19  ;;  %v684_v33 = vpack.c.bf16 %v76_v30, %v75_v29  ;;  %v60_v34 = vld [vmem:[%s1164_s1 + $0x128] sm:$0xff]  ;;  %v656_v37 = vpack.c.bf16 %v46_v36, %v45_v35  ;;  %v29_v38 = vld [vmem:[%s1164_s1 + $0x30] sm:$0xff] }
   0xa   :  { %653 = vmatprep.subr.bf16.mxu0 %v652_v28  ;;  %v30_v39 = vld [vmem:[%s1164_s1 + $0x38] sm:$0xff]  ;;  %v77_v40 = vld [vmem:[%s1164_s1 + $0x1b0] sm:$0xff]  ;;  %v686_v41 = vpack.c.bf16 %v60_v34, %v59_v31  ;;  %v47_v46 = vld [vmem:[%s1164_s1 + $0xc0] sm:$0xff] }
   0xb   :  { %683 = vmatpush3.bf16.msra.mxu1 %v682_v24  ;;  %v78_v42 = vld [vmem:[%s1164_s1 + $0x1b8] sm:$0xff]  ;;  %v61_v43 = vld [vmem:[%s1164_s1 + $0x130] sm:$0xff]  ;;  %v48_v47 = vld [vmem:[%s1164_s1 + $0xc8] sm:$0xff]  ;;  %v658_v48 = vpack.c.bf16 %v30_v39, %v29_v38 }
   0xc   :  { %685 = vmatprep.subr.bf16.mxu1 %v684_v33  ;;  %v688_v44 = vpack.c.bf16 %v78_v42, %v77_v40  ;;  %v62_v45 = vld [vmem:[%s1164_s1 + $0x138] sm:$0xff]  ;;  %v79_v49 = vld [vmem:[%s1164_s1 + $0x1c0] sm:$0xff]  ;;  %v80_v50 = vld [vmem:[%s1164_s1 + $0x1c8] sm:$0xff]  ;;  %v660_v54 = vpack.c.bf16 %v48_v47, %v47_v46 }
   0xd   :  { %655 = vmatpush3.bf16.msra.mxu0 %v654_v32  ;;  %v31_v55 = vld [vmem:[%s1164_s1 + $0x40] sm:$0xff]  ;;  %v32_v56 = vld [vmem:[%s1164_s1 + $0x48] sm:$0xff]  ;;  %v690_v57 = vpack.c.bf16 %v62_v45, %v61_v43  ;;  %v49_v58 = vld [vmem:[%s1164_s1 + $0xd0] sm:$0xff]  ;;  %v692_v60 = vpack.c.bf16 %v80_v50, %v79_v49 }
   0xe   :  { %657 = vmatprep.subr.bf16.mxu0 %v656_v37  ;;  %v50_v59 = vld [vmem:[%s1164_s1 + $0xd8] sm:$0xff]  ;;  %v63_v61 = vld [vmem:[%s1164_s1 + $0x140] sm:$0xff]  ;;  %v64_v62 = vld [vmem:[%s1164_s1 + $0x148] sm:$0xff]  ;;  %v662_v63 = vpack.c.bf16 %v32_v56, %v31_v55 }
   0xf   :  { %687 = vmatpush3.bf16.msra.mxu1 %v686_v41  ;;  %v81_v0 = vld [vmem:[%s1164_s1 + $0x1d0] sm:$0xff]  ;;  %v82_v1 = vld [vmem:[%s1164_s1 + $0x1d8] sm:$0xff]  ;;  %v664_v4 = vpack.c.bf16 %v50_v59, %v49_v58  ;;  %v694_v8 = vpack.c.bf16 %v64_v62, %v63_v61  ;;  %v51_v10 = vld [vmem:[%s1164_s1 + $0xe0] sm:$0xff] }
  0x10   :  { %689 = vmatprep.subr.bf16.mxu1 %v688_v44  ;;  %v33_v5 = vld [vmem:[%s1164_s1 + $0x50] sm:$0xff]  ;;  %v34_v6 = vld [vmem:[%s1164_s1 + $0x58] sm:$0xff]  ;;  %v52_v11 = vld [vmem:[%s1164_s1 + $0xe8] sm:$0xff]  ;;  %v696_v12 = vpack.c.bf16 %v82_v1, %v81_v0  ;;  %v791_v1 = vmov 0.0|0.0  }
  0x11   :  { %659 = vmatpush3.bf16.msra.mxu0 %v658_v48  ;;  %v65_v7 = vld [vmem:[%s1164_s1 + $0x150] sm:$0xff]  ;;  %v66_v9 = vld [vmem:[%s1164_s1 + $0x158] sm:$0xff]  ;;  %v35_v13 = vld [vmem:[%s1164_s1 + $0x60] sm:$0xff]  ;;  %v666_v16 = vpack.c.bf16 %v34_v6, %v33_v5  ;;  %v668_v21 = vpack.c.bf16 %v52_v11, %v51_v10 }
  0x12   :  { %661 = vmatprep.subr.bf16.mxu0 %v660_v54  ;;  %v36_v14 = vld [vmem:[%s1164_s1 + $0x68] sm:$0xff]  ;;  %v83_v15 = vld [vmem:[%s1164_s1 + $0x1e0] sm:$0xff]  ;;  %v53_v18 = vld [vmem:[%s1164_s1 + $0xf0] sm:$0xff]  ;;  %v698_v22 = vpack.c.bf16 %v66_v9, %v65_v7 }
  0x13   :  { %691 = vmatpush3.bf16.msra.mxu1 %v690_v57  ;;  %v84_v17 = vld [vmem:[%s1164_s1 + $0x1e8] sm:$0xff]  ;;  %v54_v19 = vld [vmem:[%s1164_s1 + $0xf8] sm:$0xff]  ;;  %v67_v26 = vld [vmem:[%s1164_s1 + $0x160] sm:$0xff]  ;;  %v670_v29 = vpack.c.bf16 %v36_v14, %v35_v13  ;;  %v793_v14 = vmov 0.0  }
  0x14   :  { %693 = vmatprep.subr.bf16.mxu1 %v692_v60  ;;  %v750_v23 = vld [vmem:[%s1163_s0] ss:$14 sps:$4 sm:$0xff]   ;;  %v752_v24 = vld [vmem:[%s1163_s0 + $0x1c] ss:$14 sps:$4 sm:$0xff]   ;;  %v700_v25 = vpack.c.bf16 %v84_v17, %v83_v15  ;;  %v754_v33 = vld [vmem:[%s1163_s0 + $0x4] ss:$14 sps:$4 sm:$0xff]   ;;  %v672_v35 = vpack.c.bf16 %v54_v19, %v53_v18 }
  0x15   :  { %663 = vmatpush3.bf16.msra.mxu0 %v662_v63  ;;  %v68_v27 = vld [vmem:[%s1164_s1 + $0x168] sm:$0xff]  ;;  %v85_v28 = vld [vmem:[%s1164_s1 + $0x1f0] sm:$0xff]  ;;  %v86_v30 = vld [vmem:[%s1164_s1 + $0x1f8] sm:$0xff]  ;;  %v146_v31 = vrot.slane %v750_v23, %v985_v20  ;;  %v160_v32 = vrot.slane %v752_v24, %v985_v20  ;;  %v153_v42 = vrot.slane %v754_v33, %v985_v20 }
  0x16   :  { %665 = vmatprep.subr.bf16.mxu0 %v664_v4  ;;  %v755_v34 = vld [vmem:[%s1163_s0 + $0x20] ss:$14 sps:$4 sm:$0xff]   ;;  %v38_v37 = vld [vmem:[%s1164_s1 + $0x78] sm:$0xff]  ;;  %v702_v38 = vpack.c.bf16 %v68_v27, %v67_v26  ;;  %v704_v44 = vpack.c.bf16 %v86_v30, %v85_v28  ;;  %v759_v5 = vld [vmem:[%s1163_s0 + $0x24] ss:$14 sps:$4 sm:$0xff]  }
  0x17   :  { %695 = vmatpush3.bf16.msra.mxu1 %v694_v8  ;;  %v37_v36 = vld [vmem:[%s1164_s1 + $0x70] sm:$0xff]  ;;  %v169_v39 = vcombine.high %v146_v31, %v160_v32  ;;  %v103_v40 = vld [vmem:[%s1164_s1 + $0x280] sm:$0xff]  ;;  %v104_v41 = vld [vmem:[%s1164_s1 + $0x288] sm:$0xff]  ;;  %v167_v43 = vrot.slane %v755_v34, %v985_v20  ;;  %v168_v55 = vcombine.low %v146_v31, %v160_v32  ;;  %v196_v11 = vrot.slane %v759_v5, %v985_v20 }
  0x18   :  { %697 = vmatprep.subr.bf16.mxu1 %v696_v12  ;;  %v69_v45 = vld [vmem:[%s1164_s1 + $0x170] sm:$0xff]  ;;  %v70_v46 = vld [vmem:[%s1164_s1 + $0x178] sm:$0xff]  ;;  %v674_v47 = vpack.c.bf16 %v38_v37, %v37_v36  ;;  %v708_v49 = vpack.c.bf16 %v104_v41, %v103_v40  ;;  %v87_v50 = vld [vmem:[%s1164_s1 + $0x200] sm:$0xff] }
  0x19   :  { %667 = vmatpush3.bf16.msra.mxu0 %v666_v16  ;;  %280 = vmatprep.mubr.f32.mxu0 %v169_v39  ;;  %v171_v48 = vcombine.high %v153_v42, %v167_v43  ;;  %v88_v51 = vld [vmem:[%s1164_s1 + $0x208] sm:$0xff]  ;;  %v706_v52 = vpack.c.bf16 %v70_v46, %v69_v45  ;;  %v105_v53 = vld [vmem:[%s1164_s1 + $0x290] sm:$0xff]  ;;  %v106_v54 = vld [vmem:[%s1164_s1 + $0x298] sm:$0xff]  ;;  %v170_v57 = vcombine.low %v153_v42, %v167_v43 }
  0x1a   :  { %669 = vmatprep.subr.bf16.mxu0 %v668_v21  ;;  %v710_v56 = vpack.c.bf16 %v88_v51, %v87_v50  ;;  %v712_v58 = vpack.c.bf16 %v106_v54, %v105_v53  ;;  %v89_v59 = vld [vmem:[%s1164_s1 + $0x210] sm:$0xff]  ;;  %v90_v60 = vld [vmem:[%s1164_s1 + $0x218] sm:$0xff]  ;;  %v107_v61 = vld [vmem:[%s1164_s1 + $0x2a0] sm:$0xff] }
  0x1b   :  { %699 = vmatpush3.bf16.msra.mxu1 %v698_v22  ;;  %350 = vmatprep.mubr.f32.mxu1 %v171_v48  ;;  %v108_v62 = vld [vmem:[%s1164_s1 + $0x2a8] sm:$0xff]  ;;  %v91_v63 = vld [vmem:[%s1164_s1 + $0x220] sm:$0xff]  ;;  %v714_v2 = vpack.c.bf16 %v90_v60, %v89_v59  ;;  %v109_v3 = vld [vmem:[%s1164_s1 + $0x2b0] sm:$0xff] }
  0x1c   :  { %701 = vmatprep.subr.bf16.mxu1 %v700_v25  ;;  %v92_v0 = vld [vmem:[%s1164_s1 + $0x228] sm:$0xff]  ;;  %v716_v6 = vpack.c.bf16 %v108_v62, %v107_v61  ;;  %v110_v9 = vld [vmem:[%s1164_s1 + $0x2b8] sm:$0xff]  ;;  %v119_v12 = vld [vmem:[%s1164_s1 + $0x300] sm:$0xff] }
  0x1d   :  { %671 = vmatpush3.bf16.msra.mxu0 %v670_v29  ;;  %v756_v4 = vld [vmem:[%s1163_s0 + $0x8] ss:$14 sps:$4 sm:$0xff]   ;;  %v758_v7 = vld [vmem:[%s1163_s0 + $0xc] ss:$14 sps:$4 sm:$0x33]   ;;  %v718_v18 = vpack.c.bf16 %v92_v0, %v91_v63  ;;  %v720_v21 = vpack.c.bf16 %v110_v9, %v109_v3  ;;  %v95_v28 = vld [vmem:[%s1164_s1 + $0x240] sm:$0xff] }
  0x1e   :  { %673 = vmatprep.subr.bf16.mxu0 %v672_v35  ;;  %v761_v8 = vld [vmem:[%s1163_s0 + $0x28] ss:$14 sps:$4 sm:$0x33]   ;;  %v182_v10 = vrot.slane %v756_v4, %v985_v20  ;;  %v189_v15 = vrot.slane %v758_v7, %v985_v20  ;;  %v94_v23 = vld [vmem:[%s1164_s1 + $0x238] sm:$0xff]  ;;  %v115_v36 = vld [vmem:[%s1164_s1 + $0x2e0] sm:$0xff] }
  0x1f   :  { %703 = vmatpush3.bf16.msra.mxu1 %v702_v38  ;;  %v120_v13 = vld [vmem:[%s1164_s1 + $0x308] sm:$0xff]  ;;  %v203_v16 = vrot.slane %v761_v8, %v985_v20  ;;  %v93_v22 = vld [vmem:[%s1164_s1 + $0x230] sm:$0xff]  ;;  %v111_v20 = vld [vmem:[%s1164_s1 + $0x2c0] sm:$0xff] }
  0x20   :  { %705 = vmatprep.subr.bf16.mxu1 %v704_v44  ;;  %v741_v17 = vpack.c.bf16 %v120_v13, %v119_v12  ;;  %v205_v19 = vcombine.high %v182_v10, %v196_v11  ;;  %v112_v25 = vld [vmem:[%s1164_s1 + $0x2c8] sm:$0xff]  ;;  %v722_v26 = vpack.c.bf16 %v94_v23, %v93_v22  ;;  %v113_v30 = vld [vmem:[%s1164_s1 + $0x2d0] sm:$0xff]  ;;  %v114_v31 = vld [vmem:[%s1164_s1 + $0x2d8] sm:$0xff] }
  0x21   :  { %675 = vmatpush3.bf16.msra.mxu0 %v674_v47  ;;  %v206_v24 = vcombine.low %v189_v15, %v203_v16  ;;  %v724_v27 = vpack.c.bf16 %v112_v25, %v111_v20  ;;  %v96_v29 = vld [vmem:[%s1164_s1 + $0x248] sm:$0xff]  ;;  %v728_v33 = vpack.c.bf16 %v114_v31, %v113_v30  ;;  %v97_v34 = vld [vmem:[%s1164_s1 + $0x250] sm:$0xff]  ;;  %v98_v35 = vld [vmem:[%s1164_s1 + $0x258] sm:$0xff] }
  0x22   :  { %709 = vmatprep.subr.bf16.mxu0 %v708_v49  ;;  %v726_v32 = vpack.c.bf16 %v96_v29, %v95_v28  ;;  %v116_v37 = vld [vmem:[%s1164_s1 + $0x2e8] sm:$0xff]  ;;  %v730_v38 = vpack.c.bf16 %v98_v35, %v97_v34  ;;  %v99_v40 = vld [vmem:[%s1164_s1 + $0x260] sm:$0xff]  ;;  %v117_v42 = vld [vmem:[%s1164_s1 + $0x2f0] sm:$0xff]  ;;  %v204_v49 = vcombine.low %v182_v10, %v196_v11 }
  0x23   :  { %707 = vmatpush3.bf16.msra.mxu1 %v706_v52  ;;  %v732_v39 = vpack.c.bf16 %v116_v37, %v115_v36  ;;  %v100_v41 = vld [vmem:[%s1164_s1 + $0x268] sm:$0xff]  ;;  %v118_v43 = vld [vmem:[%s1164_s1 + $0x2f8] sm:$0xff]  ;;  %v101_v46 = vld [vmem:[%s1164_s1 + $0x270] sm:$0xff] }
  0x24   :  { %281 = vmatmul.mubr.f32.vlgmr.msra.gmra.mrb[0].mxu0 %v168_v55  ;;  %740 = vmatprep.subr.bf16.mxu1 %v791_v1  ;;  %v734_v44 = vpack.c.bf16 %v100_v41, %v99_v40  ;;  %v736_v45 = vpack.c.bf16 %v118_v43, %v117_v42  ;;  %v102_v47 = vld [vmem:[%s1164_s1 + $0x278] sm:$0xff]  ;;  %v527_v51 = vld [vmem:[%s1165_s2] ss:$0 sm:$0xff] }
  0x25   :  { %711 = vmatpush3.bf16.msra.mxu0 %v710_v56  ;;  %420 = vmatprep.mubr.f32.mxu0 %v205_v19  ;;  %v738_v48 = vpack.c.bf16 %v102_v47, %v101_v46 }
  0x26   :  { %351 = vmatmul.mubr.f32.vlgmr.msra.gmra.mrb[0].mxu1 %v170_v57  ;;  %713 = vmatprep.subr.bf16.mxu0 %v712_v58 }
  0x27   :  { %641 = vmatprep.mubr.msk.f32.mxu1 %vm792_vm0, %v793_v14  ;;  %742 = vmatpush3.bf16.msra.mxu1 %v741_v17 }
  0x29   :  { %715 = vmatpush3.bf16.msra.mxu0 %v714_v2 }
  0x2a   :  { %717 = vmatprep.subr.bf16.mxu0 %v716_v6  ;;  %642 = vmatmul.mubr.msk.f32.vlgmr.msra.gmra.mrb[2].mxu1 %vm213_vm1, %v206_v24 }
  0x2d   :  { %719 = vmatpush3.bf16.msra.mxu0 %v718_v18 }
  0x2e   :  { %721 = vmatprep.subr.bf16.mxu0 %v720_v21 }
  0x31   :  { %723 = vmatpush3.bf16.msra.mxu0 %v722_v26 }
  0x32   :  { %725 = vmatprep.subr.bf16.mxu0 %v724_v27 }
  0x35   :  { %727 = vmatpush3.bf16.msra.mxu0 %v726_v32 }
  0x36   :  { %729 = vmatprep.subr.bf16.mxu0 %v728_v33 }
  0x39   :  { %731 = vmatpush3.bf16.msra.mxu0 %v730_v38 }
  0x3a   :  { %733 = vmatprep.subr.bf16.mxu0 %v732_v39 }
  0x3d   :  { %735 = vmatpush3.bf16.msra.mxu0 %v734_v44 }
  0x3e   :  { %737 = vmatprep.subr.bf16.mxu0 %v736_v45 }
  0x41   :  { %739 = vmatpush3.bf16.msra.mxu0 %v738_v48 }
  0x44   :  { %421 = vmatmul.mubr.f32.vlgmr.msra.gmra.mrb[2].mxu0 %v204_v49 }
  0xf7   :  { %v561_v50 = vpop.f32.mrb[0].mxu0 }
  0xf8   :  { %v562_v52 = vpop.f32.mrb[1].mxu0 }
  0xf9   :  { %v563_v53 = vadd.f32 %v562_v52, %v561_v50  ;;  %v596_v54 = vpop.f32.mrb[0].mxu1 }
  0xfa   :  { %v597_v55 = vpop.f32.mrb[1].mxu1 }
  0xfb   :  { %v283_v56 = vadd.f32 %v563_v53, %v527_v51  ;;  %v598_v57 = vadd.f32 %v597_v55, %v596_v54 }
  0xfd   :  { %v353_v58 = vadd.f32 %v598_v57, %v283_v56  ;;  %v492_v59 = vpop.f32.mrb[2].mxu1 }
  0xfe   :  { %v643_v60 = vpop.f32.mrb[3].mxu1 }
 0x117   :  { %v631_v61 = vpop.f32.mrb[2].mxu0 }
 0x118   :  { %v632_v62 = vpop.f32.mrb[3].mxu0 }
 0x119   :  { %v633_v63 = vadd.f32 %v632_v62, %v631_v61 }
 0x11b   :  { %v423_v0 = vadd.f32 %v633_v63, %v353_v58 }
 0x11d   :  { %v493_v1 = vadd.f32 %v492_v59, %v423_v0 }
 0x11f   :  { %v496_v2 = vmax.f32 %v493_v1, 0.0 }
 0x121   :  { %v498_v3 = vsel %vm497_vm2, %v496_v2, -inf }
 0x122   :  { %499 = vmax.xlane.f32.xlu0 %v498_v3 }
 0x1af   :  { %v500_v4 = vpop.xlane.xlu0 %499 }
 0x1b0   :  { %v501_v5 = vsub.f32 %v496_v2, %v500_v4 }
 0x1b2   :  { %v502_v6 = vmul.f32 1.442695, %v501_v5 }
 0x1b4   :  { %762 = vpow2.f32 %v502_v6 }
 0x1be   :  { %v763_v7 = vpop.eup %762 }
 0x1bf   :  { %v504_v8 = vsel %vm497_vm2, %v763_v7, 0.0 }
 0x1c0   :  { %505 = vadd.xlane.f32.xlu0 %v504_v8 }
 0x24d   :  { %v506_v9 = vpop.xlane.xlu0 %505 }
 0x24e   :  { %764 = vlog2.f32 %v506_v9 }
 0x258   :  { %v765_v10 = vpop.eup %764 }
 0x259   :  { %v508_v11 = vmul.f32 0.6931472, %v765_v10 }
 0x25b   :  { %v509_v12 = vsub.f32 %v501_v5, %v508_v11 }
 0x25d   :  { %510 = vst.msk [vmem:[#allocation2] sm:$0xff] %vm497_vm2, %v509_v12 }
 0x25e   :  { %515 = vsyncadd [#allocation3], 96  ;;  %s794_s1 = smov [#allocation2]  }
 0x25f   :  { %s516_s2 = sshll.u32 %s794_s1, 4  ;;  %s517_s2 = int_to_ptr.vmem [resolvable:$true] %s516_s2 }
 0x260   :  { %s766_s8 = scalar_lea.vmem %s517_s2, 32  ;;  %s770_s9 = scalar_lea.vmem %s517_s2, 128 }
 0x261   :  { %p767_p0 = scmp.ne.s32.totalorder %s517_s2, %s766_s8  ;;  %p771_p1 = scmp.lt.s32.totalorder %s517_s2, %s517_s2 }
 0x262   :  { %p772_p2 = scmp.lt.s32.totalorder %s770_s9, %s766_s8 }
 0x264   :  { %p773_p3 = por %p772_p2, %p771_p1 }
 0x266   :  { %p774_p4 = pnand %p773_p3, %p767_p0 }
 0x268   :  { %777 = shalt.err (!%p774_p4)
}
 0x269   :  { %s778_s12 = scalar_lea.hbm %s1166_s3, 32 }
 0x26a   :  { %p779_p5 = scmp.ne.s32.totalorder %s1166_s3, %s778_s12  ;;  %p782_p6 = scmp.lt.u32.totalorder %s778_s12, %s1166_s3 }
 0x26c   :  { %p784_p7 = pnand %p782_p6, %p779_p5 }
 0x26e   :  { %787 = shalt.err (!%p784_p7)
}
 0x26f   :  { %s795_s17 = smov 32   ;;  %s796_s18 = smov 2  }
 0x270   :  { %522 = dma.vmem_to_hbm [thread:$0]  %s517_s2, 32, %s1166_s3, [#allocation3], %s795_s17, %s795_s17, %s796_s18  }
 0x271   :  { %788 = dma.done.wait [#allocation3], 128  }
 0x272   :  { %789 = vsyncadd [#allocation3], 4294967168 }
 0x273   :  { %526 = vsyncpa [#allocation3], 1 }

</bundles_post_ra>
